<compile_context>
chip_gen: v7x
topology: tpu7x:2x2x1
jax: 0.10.0
libtpu: 0.0.40
codegen_flags: <defaults>
</compile_context>

<pallas_src>
import math
import numpy as np
import jax
import jax.numpy as jnp
from jax.experimental import pallas as pl
from jax.experimental.pallas import tpu as pltpu

# ----------------------------------------------------------------------------
# Cayley table for Cl(1,1,1) (Euclidean metric), shortlex blade order.
# ----------------------------------------------------------------------------
_BITMAPS = [0b000, 0b001, 0b010, 0b100, 0b011, 0b101, 0b110, 0b111]
_BM2IDX = {bm: i for i, bm in enumerate(_BITMAPS)}


def _blade_mul(bm_a, bm_b):
    a = bm_a >> 1
    swaps = 0
    while a:
        swaps += bin(a & bm_b).count("1")
        a >>= 1
    sign = -1.0 if (swaps & 1) else 1.0
    return bm_a ^ bm_b, sign


def _cayley_table():
    cay = np.zeros((8, 8, 8), np.float32)
    for i, bi in enumerate(_BITMAPS):
        for k, bk in enumerate(_BITMAPS):
            bj, s = _blade_mul(bi, bk)
            cay[i, _BM2IDX[bj], k] = s
    return cay


CAYLEY = _cayley_table()
CAYLEY_TRIPLES = [
    (i, j, k, float(CAYLEY[i, j, k]))
    for i in range(8) for j in range(8) for k in range(8)
    if CAYLEY[i, j, k] != 0.0
]

NB = 8
EPS_NORM = 1e-6
EPS_SQRT = 1e-16


# ----------------------------------------------------------------------------
# Kernel bodies
# ----------------------------------------------------------------------------
def _gp_tail(left, right, wo_ref, bo_ref, a_ref, o_ref):
    """left/right: (NB*H, T) f32 activations.  Writes one dense (NB*Cout, T) slab."""
    h8, _ = left.shape
    h = h8 // NB
    cout = o_ref.shape[0] // NB

    left_blk = [left[i * h:(i + 1) * h] for i in range(NB)]
    right_blk = [right[k * h:(k + 1) * h] for k in range(NB)]

    # ---- geometric product: unrolled sparse Cayley contraction (sign via add/sub) ----
    gp = [None] * NB
    for (i, j, k, s) in CAYLEY_TRIPLES:
        term = left_blk[i] * right_blk[k]
        if gp[j] is None:
            gp[j] = term if s > 0 else -term
        elif s > 0:
            gp[j] = gp[j] + term
        else:
            gp[j] = gp[j] - term
    gp_full = jnp.concatenate(gp, axis=0)                       # (NB*H, T)

    # ---- MVLinear out: single block-diagonal MXU dot ----
    out = jnp.dot(wo_ref[...], gp_full,
                  preferred_element_type=jnp.float32) + bo_ref[...]   # (NB*Cout, T)

    # ---- MVLayerNorm ----
    q = None
    for j in range(NB):
        blk = out[j * cout:(j + 1) * cout]
        q = blk * blk if q is None else q + blk * blk           # (Cout, T)
    norm = jnp.sqrt(jnp.sqrt(q * q + EPS_SQRT))
    mean_norm = jnp.mean(norm, axis=0, keepdims=True) + EPS_NORM
    scale = a_ref[...] * pl.reciprocal(mean_norm, approx=False)  # (Cout, T)
    scale_full = jnp.concatenate([scale] * NB, axis=0)           # (NB*Cout, T)

    o_ref[...] = (out * scale_full).astype(o_ref.dtype)          # one dense store


def _gp_kernel_shared(x_ref, wlr_ref, blr_ref, wo_ref, bo_ref, a_ref, o_ref):
    # x_ref: (NB*Cin, T); wlr_ref: (2*NB*H, NB*Cin) = [BD(Wl); BD(Wr)]
    h8 = wo_ref.shape[1]
    lr = jnp.dot(wlr_ref[...], x_ref[...],
                 preferred_element_type=jnp.float32) + blr_ref[...]
    _gp_tail(lr[:h8], lr[h8:], wo_ref, bo_ref, a_ref, o_ref)


def _gp_kernel_two(x1_ref, x2_ref, wl_ref, bl_ref, wr_ref, br_ref,
                   wo_ref, bo_ref, a_ref, o_ref):
    right = jnp.dot(wr_ref[...], x1_ref[...],
                    preferred_element_type=jnp.float32) + br_ref[...]
    left = jnp.dot(wl_ref[...], x2_ref[...],
                   preferred_element_type=jnp.float32) + bl_ref[...]
    _gp_tail(left, right, wo_ref, bo_ref, a_ref, o_ref)


# ----------------------------------------------------------------------------
# Wrapper
# ----------------------------------------------------------------------------
def _block_diag(w):
    """(O, I) -> (NB*O, NB*I) block-diagonal (same weight per blade)."""
    return jnp.kron(jnp.eye(NB, dtype=w.dtype), w)


def _bias_blade0(b, o):
    """Bias embedded only into the scalar blade (blade 0 rows)."""
    return jnp.concatenate(
        [b, jnp.zeros(((NB - 1) * o,), b.dtype)]).reshape(NB * o, 1)


def _pt_to_internal(v, bp_padded):
    """(B, C, P, NB) -> (NB*C, B*P) zero-padded along lanes to bp_padded."""
    B, C, P, _ = v.shape
    x = jnp.transpose(v, (3, 1, 0, 2)).reshape(NB * C, B * P)
    return jnp.pad(x, ((0, 0), (0, bp_padded - B * P))).astype(jnp.float32)


def _internal_to_pt(o, B, cout, P):
    """(NB*Cout, BPp) -> (B, Cout, P, NB)."""
    return jnp.transpose(o[:, :B * P].reshape(NB, cout, B, P), (2, 1, 3, 0))


def gp_layer_forward(vec1, params, vec2=None, tile_bp=512):
    """vec1/vec2: (B, C_in, P, 8) in PyTorch layout."""
    wl, bl, wr, br, wo, bo, a = params
    B, Cin, P, nb = vec1.shape
    assert nb == NB
    H = wl.shape[0]
    Cout = wo.shape[0]
    BP = B * P

    tile_bp = max(128, (tile_bp // 128) * 128)
    T = min(tile_bp, pl.cdiv(BP, 128) * 128)          # lane tile, multiple of 128
    BPp = pl.cdiv(BP, T) * T                          # padded B*P
    grid = (BPp // T,)

    wl_bd = _block_diag(wl.astype(jnp.float32))
    wr_bd = _block_diag(wr.astype(jnp.float32))
    wo_bd = _block_diag(wo.astype(jnp.float32))
    bl_e = _bias_blade0(bl.astype(jnp.float32), H)
    br_e = _bias_blade0(br.astype(jnp.float32), H)
    bo_e = _bias_blade0(bo.astype(jnp.float32), Cout)
    a_c = a.reshape(Cout, 1).astype(jnp.float32)

    x1 = _pt_to_internal(vec1, BPp)

    def full_spec(arr):
        return pl.BlockSpec(arr.shape, lambda i: (0, 0))

    x_spec = pl.BlockSpec((NB * Cin, T), lambda i: (0, i))
    o_spec = pl.BlockSpec((NB * Cout, T), lambda i: (0, i))

    flops = BPp * (2 * (2 * NB * H) * (NB * Cin)      # left+right linear
                   + 2 * 64 * H                       # geometric product
                   + 2 * (NB * Cout) * (NB * H)       # out linear
                   + 8 * NB * Cout)                   # layernorm-ish
    transcendentals = 2 * Cout * BPp

    if vec2 is None:
        # Default path: one input, one fused (left|right) block-diagonal dot.
        wlr = jnp.concatenate([wl_bd, wr_bd], axis=0)     # (2*NB*H, NB*Cin)
        blr = jnp.concatenate([bl_e, br_e], axis=0)       # (2*NB*H, 1)
        args = (x1, wlr, blr, wo_bd, bo_e, a_c)
        in_specs = [x_spec, full_spec(wlr), full_spec(blr),
                    full_spec(wo_bd), full_spec(bo_e), full_spec(a_c)]
        kernel = _gp_kernel_shared
        bytes_accessed = 4 * ((NB * Cin + NB * Cout) * BPp
                              + wlr.size + blr.size + wo_bd.size
                              + bo_e.size + a_c.size)
    else:
        x2 = _pt_to_internal(vec2, BPp)
        args = (x1, x2, wl_bd, bl_e, wr_bd, br_e, wo_bd, bo_e, a_c)
        in_specs = [x_spec, x_spec,
                    full_spec(wl_bd), full_spec(bl_e),
                    full_spec(wr_bd), full_spec(br_e),
                    full_spec(wo_bd), full_spec(bo_e), full_spec(a_c)]
        kernel = _gp_kernel_two
        bytes_accessed = 4 * ((2 * NB * Cin + NB * Cout) * BPp
                              + wl_bd.size + wr_bd.size + bl_e.size + br_e.size
                              + wo_bd.size + bo_e.size + a_c.size)

    out = pl.pallas_call(
        kernel,
        out_shape=jax.ShapeDtypeStruct((NB * Cout, BPp), jnp.float32),
        grid=grid,
        in_specs=in_specs,
        out_specs=o_spec,
        compiler_params=pltpu.CompilerParams(
            dimension_semantics=("parallel",)),
        cost_estimate=pl.CostEstimate(
            flops=int(flops),
            transcendentals=int(transcendentals),
            bytes_accessed=int(bytes_accessed)),
    )(*args)

    return _internal_to_pt(out, B, Cout, P)


# ----------------------------------------------------------------------------
# Pure-JAX reference (mirrors the PyTorch module op-for-op)
# ----------------------------------------------------------------------------
def reference_forward(vec1, params, vec2=None):
    wl, bl, wr, br, wo, bo, a = params
    cay = jnp.asarray(CAYLEY)

    def mv_linear(x, w, b):
        y = jnp.einsum('bmpi,nm->bnpi', x, w)
        bias_emb = jnp.zeros((w.shape[0], NB), x.dtype).at[:, 0].set(b)
        return y + bias_emb[None, :, None, :]

    right = mv_linear(vec1, wr, br)
    left = mv_linear(vec1 if vec2 is None else vec2, wl, bl)
    gp = jnp.einsum('...i,ijk,...k->...j', left, cay, right)
    out = mv_linear(gp, wo, bo)

    q = jnp.sum(out * out, axis=-1, keepdims=True)
    norm = jnp.sqrt(jnp.sqrt(q * q + EPS_SQRT))
    norm = jnp.mean(norm, axis=1, keepdims=True) + EPS_NORM
    return a[None, :, None, None] * out / norm


# ----------------------------------------------------------------------------
# main
# ----------------------------------------------------------------------------
if __name__ == "__main__":
    B, P = 2, 16
    IN_DIMS, HID_DIMS, OUT_DIMS = 4, 8, 4

    key = jax.random.PRNGKey(0)
    ks = jax.random.split(key, 10)

    wl = jax.random.normal(ks[0], (HID_DIMS, IN_DIMS), jnp.float32) / math.sqrt(IN_DIMS)
    wr = jax.random.normal(ks[1], (HID_DIMS, IN_DIMS), jnp.float32) / math.sqrt(IN_DIMS)
    wo = jax.random.normal(ks[2], (OUT_DIMS, HID_DIMS), jnp.float32) / math.sqrt(HID_DIMS)
    bl = 0.1 * jax.random.normal(ks[3], (HID_DIMS,), jnp.float32)
    br = 0.1 * jax.random.normal(ks[4], (HID_DIMS,), jnp.float32)
    bo = 0.1 * jax.random.normal(ks[5], (OUT_DIMS,), jnp.float32)
    a = 1.0 + 0.1 * jax.random.normal(ks[6], (OUT_DIMS,), jnp.float32)
    params = (wl, bl, wr, br, wo, bo, a)

    # --- default (vec2=None) path: fused left/right dot, padded lanes (BP=32 -> 128) ---
    vec1 = jax.random.normal(ks[7], (B, IN_DIMS, P, NB), jnp.float32)
    out = jax.block_until_ready(gp_layer_forward(vec1, params))
    ref = jax.block_until_ready(reference_forward(vec1, params))
    assert out.shape == (B, OUT_DIMS, P, NB), out.shape
    np.testing.assert_allclose(np.asarray(out), np.asarray(ref), rtol=2e-4, atol=1e-5)

    # --- explicit vec2 path + multi-tile grid (BP=1024, TILE_BP=512, 2 grid steps) ---
    B2, P2 = 2, 512
    v1 = jax.random.normal(ks[8], (B2, IN_DIMS, P2, NB), jnp.float32)
    v2 = jax.random.normal(ks[9], (B2, IN_DIMS, P2, NB), jnp.float32)
    out2 = jax.block_until_ready(gp_layer_forward(v1, params, vec2=v2))
    ref2 = jax.block_until_ready(reference_forward(v1, params, vec2=v2))
    np.testing.assert_allclose(np.asarray(out2), np.asarray(ref2), rtol=2e-4, atol=1e-5)

    print("KERNEL_OK")
</pallas_src>

<mosaic_0001>
module attributes {stable_mosaic.version = 11 : i64} {
  func.func @_gp_kernel_shared(%arg0: i32, %arg1: memref<32x128xf32, #tpu.memory_space<vmem>>, %arg2: memref<128x32xf32, #tpu.memory_space<vmem>>, %arg3: memref<128x1xf32, #tpu.memory_space<vmem>>, %arg4: memref<32x64xf32, #tpu.memory_space<vmem>>, %arg5: memref<32x1xf32, #tpu.memory_space<vmem>>, %arg6: memref<4x1xf32, #tpu.memory_space<vmem>>, %arg7: memref<32x128xf32, #tpu.memory_space<vmem>>) attributes {dimension_semantics = [#tpu.dimension_semantics<parallel>], iteration_bounds = array<i64: 1>, scalar_prefetch = 0 : i64, scratch_operands = 0 : i64, tpu.core_type = #tpu.core_type<tc>, window_params = [{transform_indices = @transform_0, window_bounds = array<i64: 32, 128>}, {pipeline_mode = #tpu.pipeline_mode<synchronous>, transform_indices = @transform_1, window_bounds = array<i64: 128, 32>}, {pipeline_mode = #tpu.pipeline_mode<synchronous>, transform_indices = @transform_2, window_bounds = array<i64: 128, 1>}, {pipeline_mode = #tpu.pipeline_mode<synchronous>, transform_indices = @transform_3, window_bounds = array<i64: 32, 64>}, {pipeline_mode = #tpu.pipeline_mode<synchronous>, transform_indices = @transform_4, window_bounds = array<i64: 32, 1>}, {pipeline_mode = #tpu.pipeline_mode<synchronous>, transform_indices = @transform_5, window_bounds = array<i64: 4, 1>}, {transform_indices = @transform_6, window_bounds = array<i64: 32, 128>}]} {
    %c0 = arith.constant 0 : index
    %c0_0 = arith.constant 0 : index
    %0 = vector.load %arg2[%c0, %c0_0] : memref<128x32xf32, #tpu.memory_space<vmem>>, vector<128x32xf32>
    %c0_1 = arith.constant 0 : index
    %c0_2 = arith.constant 0 : index
    %1 = vector.load %arg1[%c0_1, %c0_2] : memref<32x128xf32, #tpu.memory_space<vmem>>, vector<32x128xf32>
    %cst = arith.constant dense<0.000000e+00> : vector<128x128xf32>
    %2 = tpu.matmul %0, %1, %cst {dimension_numbers = #tpu.dot_dimension_numbers<[1], [0], [0], [1], [0, 0, 1, 1], [], []>} : vector<128x32xf32>, vector<32x128xf32>, vector<128x128xf32> -> vector<128x128xf32>
    %c0_3 = arith.constant 0 : index
    %c0_4 = arith.constant 0 : index
    %3 = vector.load %arg3[%c0_3, %c0_4] : memref<128x1xf32, #tpu.memory_space<vmem>>, vector<128x1xf32>
    %4 = vector.broadcast %3 : vector<128x1xf32> to vector<128x128xf32>
    %5 = arith.addf %2, %4 : vector<128x128xf32>
    %6 = vector.extract_strided_slice %5 {offsets = [0, 0], sizes = [64, 128], strides = [1, 1]} : vector<128x128xf32> to vector<64x128xf32>
    %7 = vector.extract_strided_slice %5 {offsets = [64, 0], sizes = [64, 128], strides = [1, 1]} : vector<128x128xf32> to vector<64x128xf32>
    %8 = vector.extract_strided_slice %6 {offsets = [0, 0], sizes = [8, 128], strides = [1, 1]} : vector<64x128xf32> to vector<8x128xf32>
    %9 = vector.extract_strided_slice %6 {offsets = [8, 0], sizes = [8, 128], strides = [1, 1]} : vector<64x128xf32> to vector<8x128xf32>
    %10 = vector.extract_strided_slice %6 {offsets = [16, 0], sizes = [8, 128], strides = [1, 1]} : vector<64x128xf32> to vector<8x128xf32>
    %11 = vector.extract_strided_slice %6 {offsets = [24, 0], sizes = [8, 128], strides = [1, 1]} : vector<64x128xf32> to vector<8x128xf32>
    %12 = vector.extract_strided_slice %6 {offsets = [32, 0], sizes = [8, 128], strides = [1, 1]} : vector<64x128xf32> to vector<8x128xf32>
    %13 = vector.extract_strided_slice %6 {offsets = [40, 0], sizes = [8, 128], strides = [1, 1]} : vector<64x128xf32> to vector<8x128xf32>
    %14 = vector.extract_strided_slice %6 {offsets = [48, 0], sizes = [8, 128], strides = [1, 1]} : vector<64x128xf32> to vector<8x128xf32>
    %15 = vector.extract_strided_slice %6 {offsets = [56, 0], sizes = [8, 128], strides = [1, 1]} : vector<64x128xf32> to vector<8x128xf32>
    %16 = vector.extract_strided_slice %7 {offsets = [0, 0], sizes = [8, 128], strides = [1, 1]} : vector<64x128xf32> to vector<8x128xf32>
    %17 = vector.extract_strided_slice %7 {offsets = [8, 0], sizes = [8, 128], strides = [1, 1]} : vector<64x128xf32> to vector<8x128xf32>
    %18 = vector.extract_strided_slice %7 {offsets = [16, 0], sizes = [8, 128], strides = [1, 1]} : vector<64x128xf32> to vector<8x128xf32>
    %19 = vector.extract_strided_slice %7 {offsets = [24, 0], sizes = [8, 128], strides = [1, 1]} : vector<64x128xf32> to vector<8x128xf32>
    %20 = vector.extract_strided_slice %7 {offsets = [32, 0], sizes = [8, 128], strides = [1, 1]} : vector<64x128xf32> to vector<8x128xf32>
    %21 = vector.extract_strided_slice %7 {offsets = [40, 0], sizes = [8, 128], strides = [1, 1]} : vector<64x128xf32> to vector<8x128xf32>
    %22 = vector.extract_strided_slice %7 {offsets = [48, 0], sizes = [8, 128], strides = [1, 1]} : vector<64x128xf32> to vector<8x128xf32>
    %23 = vector.extract_strided_slice %7 {offsets = [56, 0], sizes = [8, 128], strides = [1, 1]} : vector<64x128xf32> to vector<8x128xf32>
    %24 = arith.mulf %8, %16 : vector<8x128xf32>
    %25 = arith.mulf %8, %17 : vector<8x128xf32>
    %26 = arith.mulf %8, %18 : vector<8x128xf32>
    %27 = arith.mulf %8, %19 : vector<8x128xf32>
    %28 = arith.mulf %8, %20 : vector<8x128xf32>
    %29 = arith.mulf %8, %21 : vector<8x128xf32>
    %30 = arith.mulf %8, %22 : vector<8x128xf32>
    %31 = arith.mulf %8, %23 : vector<8x128xf32>
    %32 = arith.mulf %9, %17 : vector<8x128xf32>
    %33 = arith.addf %24, %32 : vector<8x128xf32>
    %34 = arith.mulf %9, %16 : vector<8x128xf32>
    %35 = arith.addf %25, %34 : vector<8x128xf32>
    %36 = arith.mulf %9, %20 : vector<8x128xf32>
    %37 = arith.addf %26, %36 : vector<8x128xf32>
    %38 = arith.mulf %9, %21 : vector<8x128xf32>
    %39 = arith.addf %27, %38 : vector<8x128xf32>
    %40 = arith.mulf %9, %18 : vector<8x128xf32>
    %41 = arith.addf %28, %40 : vector<8x128xf32>
    %42 = arith.mulf %9, %19 : vector<8x128xf32>
    %43 = arith.addf %29, %42 : vector<8x128xf32>
    %44 = arith.mulf %9, %23 : vector<8x128xf32>
    %45 = arith.addf %30, %44 : vector<8x128xf32>
    %46 = arith.mulf %9, %22 : vector<8x128xf32>
    %47 = arith.addf %31, %46 : vector<8x128xf32>
    %48 = arith.mulf %10, %18 : vector<8x128xf32>
    %49 = arith.addf %33, %48 : vector<8x128xf32>
    %50 = arith.mulf %10, %20 : vector<8x128xf32>
    %51 = arith.subf %35, %50 : vector<8x128xf32>
    %52 = arith.mulf %10, %16 : vector<8x128xf32>
    %53 = arith.addf %37, %52 : vector<8x128xf32>
    %54 = arith.mulf %10, %22 : vector<8x128xf32>
    %55 = arith.addf %39, %54 : vector<8x128xf32>
    %56 = arith.mulf %10, %17 : vector<8x128xf32>
    %57 = arith.subf %41, %56 : vector<8x128xf32>
    %58 = arith.mulf %10, %23 : vector<8x128xf32>
    %59 = arith.subf %43, %58 : vector<8x128xf32>
    %60 = arith.mulf %10, %19 : vector<8x128xf32>
    %61 = arith.addf %45, %60 : vector<8x128xf32>
    %62 = arith.mulf %10, %21 : vector<8x128xf32>
    %63 = arith.subf %47, %62 : vector<8x128xf32>
    %64 = arith.mulf %11, %19 : vector<8x128xf32>
    %65 = arith.addf %49, %64 : vector<8x128xf32>
    %66 = arith.mulf %11, %21 : vector<8x128xf32>
    %67 = arith.subf %51, %66 : vector<8x128xf32>
    %68 = arith.mulf %11, %22 : vector<8x128xf32>
    %69 = arith.subf %53, %68 : vector<8x128xf32>
    %70 = arith.mulf %11, %16 : vector<8x128xf32>
    %71 = arith.addf %55, %70 : vector<8x128xf32>
    %72 = arith.mulf %11, %23 : vector<8x128xf32>
    %73 = arith.addf %57, %72 : vector<8x128xf32>
    %74 = arith.mulf %11, %17 : vector<8x128xf32>
    %75 = arith.subf %59, %74 : vector<8x128xf32>
    %76 = arith.mulf %11, %18 : vector<8x128xf32>
    %77 = arith.subf %61, %76 : vector<8x128xf32>
    %78 = arith.mulf %11, %20 : vector<8x128xf32>
    %79 = arith.addf %63, %78 : vector<8x128xf32>
    %80 = arith.mulf %12, %20 : vector<8x128xf32>
    %81 = arith.subf %65, %80 : vector<8x128xf32>
    %82 = arith.mulf %12, %18 : vector<8x128xf32>
    %83 = arith.addf %67, %82 : vector<8x128xf32>
    %84 = arith.mulf %12, %17 : vector<8x128xf32>
    %85 = arith.subf %69, %84 : vector<8x128xf32>
    %86 = arith.mulf %12, %23 : vector<8x128xf32>
    %87 = arith.subf %71, %86 : vector<8x128xf32>
    %88 = arith.mulf %12, %16 : vector<8x128xf32>
    %89 = arith.addf %73, %88 : vector<8x128xf32>
    %90 = arith.mulf %12, %22 : vector<8x128xf32>
    %91 = arith.addf %75, %90 : vector<8x128xf32>
    %92 = arith.mulf %12, %21 : vector<8x128xf32>
    %93 = arith.subf %77, %92 : vector<8x128xf32>
    %94 = arith.mulf %12, %19 : vector<8x128xf32>
    %95 = arith.addf %79, %94 : vector<8x128xf32>
    %96 = arith.mulf %13, %21 : vector<8x128xf32>
    %97 = arith.subf %81, %96 : vector<8x128xf32>
    %98 = arith.mulf %13, %19 : vector<8x128xf32>
    %99 = arith.addf %83, %98 : vector<8x128xf32>
    %100 = arith.mulf %13, %23 : vector<8x128xf32>
    %101 = arith.addf %85, %100 : vector<8x128xf32>
    %102 = arith.mulf %13, %17 : vector<8x128xf32>
    %103 = arith.subf %87, %102 : vector<8x128xf32>
    %104 = arith.mulf %13, %22 : vector<8x128xf32>
    %105 = arith.subf %89, %104 : vector<8x128xf32>
    %106 = arith.mulf %13, %16 : vector<8x128xf32>
    %107 = arith.addf %91, %106 : vector<8x128xf32>
    %108 = arith.mulf %13, %20 : vector<8x128xf32>
    %109 = arith.addf %93, %108 : vector<8x128xf32>
    %110 = arith.mulf %13, %18 : vector<8x128xf32>
    %111 = arith.subf %95, %110 : vector<8x128xf32>
    %112 = arith.mulf %14, %22 : vector<8x128xf32>
    %113 = arith.subf %97, %112 : vector<8x128xf32>
    %114 = arith.mulf %14, %23 : vector<8x128xf32>
    %115 = arith.subf %99, %114 : vector<8x128xf32>
    %116 = arith.mulf %14, %19 : vector<8x128xf32>
    %117 = arith.addf %101, %116 : vector<8x128xf32>
    %118 = arith.mulf %14, %18 : vector<8x128xf32>
    %119 = arith.subf %103, %118 : vector<8x128xf32>
    %120 = arith.mulf %14, %21 : vector<8x128xf32>
    %121 = arith.addf %105, %120 : vector<8x128xf32>
    %122 = arith.mulf %14, %20 : vector<8x128xf32>
    %123 = arith.subf %107, %122 : vector<8x128xf32>
    %124 = arith.mulf %14, %16 : vector<8x128xf32>
    %125 = arith.addf %109, %124 : vector<8x128xf32>
    %126 = arith.mulf %14, %17 : vector<8x128xf32>
    %127 = arith.addf %111, %126 : vector<8x128xf32>
    %128 = arith.mulf %15, %23 : vector<8x128xf32>
    %129 = arith.subf %113, %128 : vector<8x128xf32>
    %130 = arith.mulf %15, %22 : vector<8x128xf32>
    %131 = arith.subf %115, %130 : vector<8x128xf32>
    %132 = arith.mulf %15, %21 : vector<8x128xf32>
    %133 = arith.addf %117, %132 : vector<8x128xf32>
    %134 = arith.mulf %15, %20 : vector<8x128xf32>
    %135 = arith.subf %119, %134 : vector<8x128xf32>
    %136 = arith.mulf %15, %19 : vector<8x128xf32>
    %137 = arith.addf %121, %136 : vector<8x128xf32>
    %138 = arith.mulf %15, %18 : vector<8x128xf32>
    %139 = arith.subf %123, %138 : vector<8x128xf32>
    %140 = arith.mulf %15, %17 : vector<8x128xf32>
    %141 = arith.addf %125, %140 : vector<8x128xf32>
    %142 = arith.mulf %15, %16 : vector<8x128xf32>
    %143 = arith.addf %127, %142 : vector<8x128xf32>
    %144 = tpu.concatenate %129, %131, %133, %135, %137, %139, %141, %143 in 0 : vector<8x128xf32>, vector<8x128xf32>, vector<8x128xf32>, vector<8x128xf32>, vector<8x128xf32>, vector<8x128xf32>, vector<8x128xf32>, vector<8x128xf32> -> vector<64x128xf32>
    %c0_5 = arith.constant 0 : index
    %c0_6 = arith.constant 0 : index
    %145 = vector.load %arg4[%c0_5, %c0_6] : memref<32x64xf32, #tpu.memory_space<vmem>>, vector<32x64xf32>
    %cst_7 = arith.constant dense<0.000000e+00> : vector<32x128xf32>
    %146 = tpu.matmul %145, %144, %cst_7 {dimension_numbers = #tpu.dot_dimension_numbers<[1], [0], [0], [1], [0, 0, 1, 1], [], []>} : vector<32x64xf32>, vector<64x128xf32>, vector<32x128xf32> -> vector<32x128xf32>
    %c0_8 = arith.constant 0 : index
    %c0_9 = arith.constant 0 : index
    %147 = vector.load %arg5[%c0_8, %c0_9] : memref<32x1xf32, #tpu.memory_space<vmem>>, vector<32x1xf32>
    %148 = vector.broadcast %147 : vector<32x1xf32> to vector<32x128xf32>
    %149 = arith.addf %146, %148 : vector<32x128xf32>
    %150 = vector.extract_strided_slice %149 {offsets = [0, 0], sizes = [4, 128], strides = [1, 1]} : vector<32x128xf32> to vector<4x128xf32>
    %151 = arith.mulf %150, %150 : vector<4x128xf32>
    %152 = vector.extract_strided_slice %149 {offsets = [4, 0], sizes = [4, 128], strides = [1, 1]} : vector<32x128xf32> to vector<4x128xf32>
    %153 = arith.mulf %152, %152 : vector<4x128xf32>
    %154 = arith.addf %151, %153 : vector<4x128xf32>
    %155 = vector.extract_strided_slice %149 {offsets = [8, 0], sizes = [4, 128], strides = [1, 1]} : vector<32x128xf32> to vector<4x128xf32>
    %156 = arith.mulf %155, %155 : vector<4x128xf32>
    %157 = arith.addf %154, %156 : vector<4x128xf32>
    %158 = vector.extract_strided_slice %149 {offsets = [12, 0], sizes = [4, 128], strides = [1, 1]} : vector<32x128xf32> to vector<4x128xf32>
    %159 = arith.mulf %158, %158 : vector<4x128xf32>
    %160 = arith.addf %157, %159 : vector<4x128xf32>
    %161 = vector.extract_strided_slice %149 {offsets = [16, 0], sizes = [4, 128], strides = [1, 1]} : vector<32x128xf32> to vector<4x128xf32>
    %162 = arith.mulf %161, %161 : vector<4x128xf32>
    %163 = arith.addf %160, %162 : vector<4x128xf32>
    %164 = vector.extract_strided_slice %149 {offsets = [20, 0], sizes = [4, 128], strides = [1, 1]} : vector<32x128xf32> to vector<4x128xf32>
    %165 = arith.mulf %164, %164 : vector<4x128xf32>
    %166 = arith.addf %163, %165 : vector<4x128xf32>
    %167 = vector.extract_strided_slice %149 {offsets = [24, 0], sizes = [4, 128], strides = [1, 1]} : vector<32x128xf32> to vector<4x128xf32>
    %168 = arith.mulf %167, %167 : vector<4x128xf32>
    %169 = arith.addf %166, %168 : vector<4x128xf32>
    %170 = vector.extract_strided_slice %149 {offsets = [28, 0], sizes = [4, 128], strides = [1, 1]} : vector<32x128xf32> to vector<4x128xf32>
    %171 = arith.mulf %170, %170 : vector<4x128xf32>
    %172 = arith.addf %169, %171 : vector<4x128xf32>
    %173 = arith.mulf %172, %172 : vector<4x128xf32>
    %cst_10 = arith.constant 1.000000e-16 : f32
    %174 = vector.broadcast %cst_10 : f32 to vector<4x128xf32>
    %175 = arith.addf %173, %174 : vector<4x128xf32>
    %176 = math.sqrt %175 : vector<4x128xf32>
    %177 = math.sqrt %176 : vector<4x128xf32>
    %cst_11 = arith.constant dense<0.000000e+00> : vector<128xf32>
    %178 = vector.multi_reduction <add>, %177, %cst_11 [0] : vector<4x128xf32> to vector<128xf32>
    %179 = vector.shape_cast %178 : vector<128xf32> to vector<1x128xf32>
    %cst_12 = arith.constant 4.000000e+00 : f32
    %180 = vector.broadcast %cst_12 : f32 to vector<1x128xf32>
    %181 = arith.divf %179, %180 : vector<1x128xf32>
    %cst_13 = arith.constant 9.99999997E-7 : f32
    %182 = vector.broadcast %cst_13 : f32 to vector<1x128xf32>
    %183 = arith.addf %181, %182 : vector<1x128xf32>
    %c0_14 = arith.constant 0 : index
    %c0_15 = arith.constant 0 : index
    %184 = vector.load %arg6[%c0_14, %c0_15] : memref<4x1xf32, #tpu.memory_space<vmem>>, vector<4x1xf32>
    %185 = tpu.reciprocal %183 : vector<1x128xf32> -> vector<1x128xf32>
    %186 = vector.broadcast %184 : vector<4x1xf32> to vector<4x128xf32>
    %187 = vector.broadcast %185 : vector<1x128xf32> to vector<4x128xf32>
    %188 = arith.mulf %186, %187 : vector<4x128xf32>
    %189 = tpu.concatenate %188, %188, %188, %188, %188, %188, %188, %188 in 0 : vector<4x128xf32>, vector<4x128xf32>, vector<4x128xf32>, vector<4x128xf32>, vector<4x128xf32>, vector<4x128xf32>, vector<4x128xf32>, vector<4x128xf32> -> vector<32x128xf32>
    %190 = arith.mulf %149, %189 : vector<32x128xf32>
    %c0_16 = arith.constant 0 : index
    %c0_17 = arith.constant 0 : index
    %191 = vector.load %arg7[%c0_16, %c0_17] : memref<32x128xf32, #tpu.memory_space<vmem>>, vector<32x128xf32>
    tpu.vector_store %arg7[%c0_16, %c0_17], %190 {strides = array<i32>} : memref<32x128xf32, #tpu.memory_space<vmem>>, vector<32x128xf32>,
    return
  }
  func.func @transform_0(%arg0: i32) -> (i32, i32) {
    %c0_i32 = arith.constant 0 : i32
    %c0_i32_0 = arith.constant 0 : i32
    return %c0_i32, %arg0 : i32, i32
  }
  func.func @transform_1(%arg0: i32) -> (i32, i32) {
    %c0_i32 = arith.constant 0 : i32
    %c0_i32_0 = arith.constant 0 : i32
    %c0_i32_1 = arith.constant 0 : i32
    return %c0_i32, %c0_i32_0 : i32, i32
  }
  func.func @transform_2(%arg0: i32) -> (i32, i32) {
    %c0_i32 = arith.constant 0 : i32
    %c0_i32_0 = arith.constant 0 : i32
    %c0_i32_1 = arith.constant 0 : i32
    return %c0_i32, %c0_i32_0 : i32, i32
  }
  func.func @transform_3(%arg0: i32) -> (i32, i32) {
    %c0_i32 = arith.constant 0 : i32
    %c0_i32_0 = arith.constant 0 : i32
    %c0_i32_1 = arith.constant 0 : i32
    return %c0_i32, %c0_i32_0 : i32, i32
  }
  func.func @transform_4(%arg0: i32) -> (i32, i32) {
    %c0_i32 = arith.constant 0 : i32
    %c0_i32_0 = arith.constant 0 : i32
    %c0_i32_1 = arith.constant 0 : i32
    return %c0_i32, %c0_i32_0 : i32, i32
  }
  func.func @transform_5(%arg0: i32) -> (i32, i32) {
    %c0_i32 = arith.constant 0 : i32
    %c0_i32_0 = arith.constant 0 : i32
    %c0_i32_1 = arith.constant 0 : i32
    return %c0_i32, %c0_i32_0 : i32, i32
  }
  func.func @transform_6(%arg0: i32) -> (i32, i32) {
    %c0_i32 = arith.constant 0 : i32
    %c0_i32_0 = arith.constant 0 : i32
    return %c0_i32, %arg0 : i32, i32
  }
}

</mosaic_0001>

<bundles_post_ra>
// kernel: tpu_custom_call.1
= control target key start
LH: loop header
LB: loop body
LE: loop exit
PB: predicated region body
PF: predicated region fallthrough
CT: control target
= control target key end

     0   :  { %vm140_vm0 = vcmask 261120   ;;  %v832_v6 = vmov 0   ;;  %s1225_s0 = inlined_call_operand.vmem [shape: f32[32,128], index: 0, kind: input, shape index: {}]   ;;  %s1226_s1 = inlined_call_operand.vmem [shape: f32[128,32], index: 1, kind: input, shape index: {}]   ;;  %s1227_s2 = inlined_call_operand.vmem [shape: f32[128,1], index: 2, kind: input, shape index: {}]   ;;  %s1228_s3 = inlined_call_operand.vmem [shape: f32[32,64], index: 3, kind: input, shape index: {}]   ;;  %s1229_s4 = inlined_call_operand.vmem [shape: f32[32,1], index: 4, kind: input, shape index: {}]   ;;  %s1230_s5 = inlined_call_operand.vmem [shape: f32[4,1], index: 5, kind: input, shape index: {}]   ;;  %s1231_s6 = inlined_call_operand.hbm [shape: f32[32,128], index: 6, kind: output, shape index: {}]  }
   0x1   :  { %v40_v0 = vld [vmem:[%s1225_s0] sm:$0xff]  ;;  %v41_v1 = vld [vmem:[%s1225_s0 + $0x8] sm:$0xff]  ;;  %v42_v2 = vld [vmem:[%s1225_s0 + $0x10] sm:$0xff]  ;;  %800 = vset.pattern.permute.xlu0 %v832_v6  ;;  %801 = vset.pattern.permute.xlu1 %v832_v6 }
   0x2   :  { %v772_v3 = vpack.c.bf16 %v41_v1, %v40_v0  ;;  %v43_v4 = vld [vmem:[%s1225_s0 + $0x18] sm:$0xff]  ;;  %v24_v5 = vld [vmem:[%s1226_s1] sm:$0xff]  ;;  %v25_v10 = vld [vmem:[%s1226_s1 + $0x8] sm:$0xff] }
   0x3   :  { %v776_v7 = vpack.c.bf16 %v43_v4, %v42_v2  ;;  %726 = vmatprep.mubr.msk.f32.mxu0 %vm140_vm0, %v24_v5  ;;  %v44_v8 = vld [vmem:[%s1227_s2] sm:$0xff]  ;;  %v45_v11 = vld [vmem:[%s1227_s2 + $0x8] sm:$0xff]  ;;  %v26_v12 = vld [vmem:[%s1226_s1 + $0x10] sm:$0xff] }
   0x4   :  { %773 = vmatprep.subr.bf16.mxu0 %v772_v3  ;;  %62 = vperm.xlu0 %800, %v44_v8   ;;  %v52_v9 = vld [vmem:[%s1227_s2 + $0x40] sm:$0xff]  ;;  %v53_v13 = vld [vmem:[%s1227_s2 + $0x48] sm:$0xff]  ;;  %v27_v14 = vld [vmem:[%s1226_s1 + $0x18] sm:$0xff] }
   0x5   :  { %775 = vmatpush3.bf16.msra.mxu0 %v772_v3  ;;  %102 = vperm.xlu1 %801, %v52_v9   ;;  %v46_v15 = vld [vmem:[%s1227_s2 + $0x10] sm:$0xff]  ;;  %v28_v16 = vld [vmem:[%s1226_s1 + $0x20] sm:$0xff] }
   0x6   :  { %777 = vmatprep.subr.bf16.mxu0 %v776_v7  ;;  %v54_v17 = vld [vmem:[%s1227_s2 + $0x50] sm:$0xff] }
   0x8   :  { %67 = vperm.xlu0 %800, %v45_v11  }
   0x9   :  { %779 = vmatpush3.bf16.msra.mxu0 %v776_v7  ;;  %107 = vperm.xlu1 %801, %v53_v13  }
   0xc   :  { %727 = vmatmul.mubr.msk.f32.vlgmr.msra.gmra.mrb[0].mxu0 %vm140_vm0, %v25_v10 }
   0xd   :  { %729 = vmatprep.mubr.msk.f32.mxu0 %vm140_vm0, %v26_v12 }
   0xe   :  { %11 = vsyncpa [#allocation3], 0  ;;  %72 = vperm.xlu0 %800, %v46_v15   ;;  %v29_v18 = vld [vmem:[%s1226_s1 + $0x28] sm:$0xff]  ;;  %v56_v19 = vld [vmem:[%s1227_s2 + $0x60] sm:$0xff]  ;;  %112 = vperm.xlu1 %801, %v54_v17   ;;  %vm482_vm1 = vcmask 523264   ;;  %vm619_vm5 = vcmask 1043456  }
   0xf   :  { %v30_v20 = vld [vmem:[%s1226_s1 + $0x30] sm:$0xff]  ;;  %v47_v21 = vld [vmem:[%s1227_s2 + $0x18] sm:$0xff]  ;;  %v32_v24 = vld [vmem:[%s1226_s1 + $0x40] sm:$0xff] }
  0x10   :  { %730 = vmatmul.mubr.msk.f32.gmra.mrb[2].mxu0 %vm140_vm0, %v27_v14  ;;  %v31_v22 = vld [vmem:[%s1226_s1 + $0x38] sm:$0xff]  ;;  %v57_v25 = vld [vmem:[%s1227_s2 + $0x68] sm:$0xff]  ;;  %v48_v27 = vld [vmem:[%s1227_s2 + $0x20] sm:$0xff] }
  0x11   :  { %732 = vmatprep.mubr.msk.f32.mxu0 %vm140_vm0, %v28_v16  ;;  %v55_v23 = vld [vmem:[%s1227_s2 + $0x58] sm:$0xff]  ;;  %v33_v26 = vld [vmem:[%s1226_s1 + $0x48] sm:$0xff]  ;;  %v34_v28 = vld [vmem:[%s1226_s1 + $0x50] sm:$0xff] }
  0x12   :  { %122 = vperm.xlu0 %800, %v56_v19   ;;  %77 = vperm.xlu1 %801, %v47_v21   ;;  %v58_v29 = vld [vmem:[%s1227_s2 + $0x70] sm:$0xff]  ;;  %v35_v30 = vld [vmem:[%s1226_s1 + $0x58] sm:$0xff]  ;;  %v49_v31 = vld [vmem:[%s1227_s2 + $0x28] sm:$0xff] }
  0x13   :  { %v36_v32 = vld [vmem:[%s1226_s1 + $0x60] sm:$0xff]  ;;  %v50_v33 = vld [vmem:[%s1227_s2 + $0x30] sm:$0xff]  ;;  %v37_v34 = vld [vmem:[%s1226_s1 + $0x68] sm:$0xff] }
  0x14   :  { %733 = vmatmul.mubr.msk.f32.gmra.mrb[4].mxu0 %vm140_vm0, %v29_v18  ;;  %v59_v35 = vld [vmem:[%s1227_s2 + $0x78] sm:$0xff]  ;;  %v38_v36 = vld [vmem:[%s1226_s1 + $0x70] sm:$0xff]  ;;  %v458_v39 = vld [vmem:[%s1229_s4] sm:$0xff] }
  0x15   :  { %735 = vmatprep.mubr.msk.f32.mxu0 %vm140_vm0, %v30_v20  ;;  %v51_v37 = vld [vmem:[%s1227_s2 + $0x38] sm:$0xff]  ;;  %v459_v40 = vld [vmem:[%s1229_s4 + $0x8] sm:$0xff]  ;;  %v460_v41 = vld [vmem:[%s1229_s4 + $0x10] sm:$0xff] }
  0x16   :  { %117 = vperm.xlu0 %800, %v55_v23   ;;  %127 = vperm.xlu1 %801, %v57_v25   ;;  %v39_v38 = vld [vmem:[%s1226_s1 + $0x78] sm:$0xff]  ;;  %v630_v43 = vld [vmem:[%s1230_s5] sm:$0xf] }
  0x17   :  { %v461_v42 = vld [vmem:[%s1229_s4 + $0x18] sm:$0xff]  ;;  %v454_v44 = vld [vmem:[%s1228_s3] sm:$0xff] }
  0x18   :  { %736 = vmatmul.mubr.msk.f32.gmra.mrb[6].mxu0 %vm140_vm0, %v31_v22  ;;  %766 = vmatprep.mubr.msk.f32.mxu1 %vm482_vm1, %v454_v44 }
  0x19   :  { %738 = vmatprep.mubr.msk.f32.mxu0 %vm140_vm0, %v32_v24 }
  0x1a   :  { %82 = vperm.xlu0 %800, %v48_v27   ;;  %132 = vperm.xlu1 %801, %v58_v29  }
  0x1c   :  { %739 = vmatmul.mubr.msk.f32.gmra.mrb[8].mxu0 %vm140_vm0, %v33_v26 }
  0x1d   :  { %741 = vmatprep.mubr.msk.f32.mxu0 %vm140_vm0, %v34_v28 }
  0x1e   :  { %87 = vperm.xlu0 %800, %v49_v31   ;;  %92 = vperm.xlu1 %801, %v50_v33  }
  0x20   :  { %742 = vmatmul.mubr.msk.f32.gmra.mrb[10].mxu0 %vm140_vm0, %v35_v30 }
  0x21   :  { %744 = vmatprep.mubr.msk.f32.mxu0 %vm140_vm0, %v36_v32 }
  0x22   :  { %137 = vperm.xlu0 %800, %v59_v35   ;;  %97 = vperm.xlu1 %801, %v51_v37  }
  0x24   :  { %745 = vmatmul.mubr.msk.f32.gmra.mrb[12].mxu0 %vm140_vm0, %v37_v34 }
  0x25   :  { %747 = vmatprep.mubr.msk.f32.mxu0 %vm140_vm0, %v38_v36 }
  0x26   :  { %464 = vperm.xlu0 %800, %v458_v39   ;;  %469 = vperm.xlu1 %801, %v459_v40  }
  0x28   :  { %748 = vmatmul.mubr.msk.f32.gmra.mrb[14].mxu0 %vm140_vm0, %v39_v38 }
  0x2a   :  { %474 = vperm.xlu0 %800, %v460_v41   ;;  %479 = vperm.xlu1 %801, %v461_v42  }
  0x2e   :  { %634 = vperm.xlu0 %800, %v630_v43  }
  0x83   :  { %v63_v46 = vpop.permute.xlu0 %62 }
  0x84   :  { %v103_v45 = vpop.permute.xlu1 %102 }
  0x87   :  { %v68_v48 = vpop.permute.xlu0 %67 }
  0x88   :  { %v108_v47 = vpop.permute.xlu1 %107 }
  0x8d   :  { %v113_v49 = vpop.permute.xlu1 %112  ;;  %v73_v50 = vpop.permute.xlu0 %72 }
  0x91   :  { %v78_v51 = vpop.permute.xlu1 %77  ;;  %v123_v52 = vpop.permute.xlu0 %122 }
  0x95   :  { %v128_v53 = vpop.permute.xlu1 %127  ;;  %v118_v56 = vpop.permute.xlu0 %117 }
  0x99   :  { %v1014_v58 = vpop.permute.xlu1 %132  ;;  %v83_v62 = vpop.permute.xlu0 %82 }
  0x9d   :  { %v93_v63 = vpop.permute.xlu1 %92  ;;  %v88_v2 = vpop.permute.xlu0 %87 }
  0xa1   :  { %v98_v6 = vpop.permute.xlu1 %97 }
  0xdf   :  { %v728_v54 = vpop.f32.mrb[0].mxu0 }
  0xe0   :  { %v255_v55 = vpop.f32.mrb[1].mxu0  ;;  %v1016_v3 = vadd.f32 %v728_v54, %v68_v48 }
  0xe1   :  { %v1018_v4 = vadd.f32 %v255_v55, %v63_v46 }
  0xe3   :  { %v731_v57 = vpop.f32.mrb[2].mxu0 }
  0xe4   :  { %v265_v59 = vpop.f32.mrb[3].mxu0  ;;  %v1020_v7 = vadd.f32 %v731_v57, %v78_v51 }
  0xe5   :  { %v1028_v12 = vadd.f32 %v265_v59, %v73_v50 }
  0xe7   :  { %v734_v60 = vpop.f32.mrb[4].mxu0 }
  0xe8   :  { %v275_v61 = vpop.f32.mrb[5].mxu0  ;;  %v1022_v8 = vadd.f32 %v734_v60, %v88_v2 }
  0xe9   :  { %v1024_v9 = vadd.f32 %v275_v61, %v83_v62 }
  0xeb   :  { %v737_v0 = vpop.f32.mrb[6].mxu0 }
  0xec   :  { %v285_v1 = vpop.f32.mrb[7].mxu0  ;;  %v1030_v13 = vadd.f32 %v737_v0, %v98_v6 }
  0xed   :  { %v1032_v14 = vadd.f32 %v285_v1, %v93_v63 }
  0xef   :  { %v740_v5 = vpop.f32.mrb[8].mxu0 }
  0xf0   :  { %v1026_v10 = vadd.f32 %v740_v5, %v108_v47  ;;  %v295_v11 = vpop.f32.mrb[9].mxu0 }
  0xf1   :  { %v1034_v15 = vadd.f32 %v295_v11, %v103_v45 }
  0xf2   :  { %v335_v16 = vmul.f32 %v1026_v10, %v1018_v4  ;;  %v342_v17 = vmul.f32 %v1026_v10, %v1016_v3  ;;  %v1042_v18 = vmul.f32 %v1026_v10, %v1024_v9  ;;  %v1046_v19 = vmul.f32 %v1026_v10, %v1022_v8 }
  0xf3   :  { %v743_v20 = vpop.f32.mrb[10].mxu0  ;;  %v334_v21 = vmul.f32 %v1034_v15, %v1018_v4  ;;  %v344_v22 = vmul.f32 %v1034_v15, %v1016_v3  ;;  %v362_v23 = vmul.f32 %v1034_v15, %v1028_v12  ;;  %v1056_v24 = vmul.f32 %v1034_v15, %v1020_v7 }
  0xf4   :  { %v1058_v25 = vadd.f32 %v743_v20, %v118_v56  ;;  %v305_v26 = vpop.f32.mrb[11].mxu0  ;;  %v1062_v27 = vmul.f32 %v1026_v10, %v1028_v12  ;;  %v1066_v28 = vmul.f32 %v1026_v10, %v1020_v7  ;;  %v1070_v29 = vmul.f32 %v1034_v15, %v1024_v9  ;;  %v138_v56 = vpop.permute.xlu0 %137 }
  0xf5   :  { %v1072_v30 = vadd.f32 %v305_v26, %v113_v49  ;;  %v343_v31 = vadd.f32 %v342_v17, %v334_v21  ;;  %v345_v32 = vadd.f32 %v344_v22, %v335_v16  ;;  %v1076_v33 = vmul.f32 %v1034_v15, %v1022_v8 }
  0xf6   :  { %v374_v34 = vmul.f32 %v1058_v25, %v1020_v7  ;;  %v408_v35 = vmul.f32 %v1058_v25, %v1022_v8  ;;  %v337_v36 = vmul.f32 %v1058_v25, %v1018_v4  ;;  %v1086_v37 = vmul.f32 %v1058_v25, %v1032_v14 }
  0xf7   :  { %v746_v38 = vpop.f32.mrb[12].mxu0  ;;  %v358_v39 = vmul.f32 %v1072_v30, %v1028_v12  ;;  %v392_v40 = vmul.f32 %v1072_v30, %v1024_v9  ;;  %v336_v41 = vmul.f32 %v1072_v30, %v1018_v4  ;;  %v1096_v42 = vmul.f32 %v1072_v30, %v1032_v14 }
  0xf8   :  { %v1098_v43 = vadd.f32 %v746_v38, %v128_v53  ;;  %v315_v44 = vpop.f32.mrb[13].mxu0  ;;  %v350_v45 = vmul.f32 %v1072_v30, %v1016_v3  ;;  %v352_v46 = vmul.f32 %v1058_v25, %v1016_v3  ;;  %v1106_v47 = vmul.f32 %v1058_v25, %v1030_v13 }
  0xf9   :  { %v1108_v48 = vadd.f32 %v315_v44, %v123_v52  ;;  %v359_v49 = vadd.f32 %v358_v39, %v343_v31  ;;  %v1112_v50 = vmul.f32 %v1072_v30, %v1030_v13  ;;  %v1116_v51 = vmul.f32 %v1058_v25, %v1028_v12 }
  0xfa   :  { %v376_v53 = vmul.f32 %v1098_v43, %v1020_v7  ;;  %v406_v54 = vmul.f32 %v1098_v43, %v1022_v8  ;;  %v348_v55 = vmul.f32 %v1098_v43, %v1016_v3  ;;  %v1126_v52 = vmul.f32 %v1098_v43, %v1030_v13 }
  0xfb   :  { %v749_v57 = vpop.f32.mrb[14].mxu0  ;;  %v360_v59 = vmul.f32 %v1108_v48, %v1028_v12  ;;  %v375_v60 = vadd.f32 %v374_v34, %v359_v49  ;;  %v390_v61 = vmul.f32 %v1108_v48, %v1024_v9  ;;  %v346_v62 = vmul.f32 %v1108_v48, %v1016_v3 }
  0xfc   :  { %v331_v63 = vadd.f32 %v749_v57, %v138_v56  ;;  %v325_v0 = vpop.f32.mrb[15].mxu0  ;;  %v349_v1 = vadd.f32 %v348_v55, %v337_v36  ;;  %v1136_v2 = vmul.f32 %v1108_v48, %v1030_v13  ;;  %v338_v5 = vmul.f32 %v1108_v48, %v1018_v4 }
  0xfd   :  { %v326_v6 = vadd.f32 %v325_v0, %v1014_v58  ;;  %v361_v11 = vsub.f32 %v345_v32, %v360_v59  ;;  %v391_v16 = vsub.f32 %v375_v60, %v390_v61  ;;  %v347_v17 = vadd.f32 %v346_v62, %v336_v41 }
  0xfe   :  { %v424_v20 = vmul.f32 %v331_v63, %v1032_v14  ;;  %v438_v21 = vmul.f32 %v331_v63, %v1030_v13  ;;  %v396_v22 = vmul.f32 %v331_v63, %v1024_v9  ;;  %v410_v26 = vmul.f32 %v331_v63, %v1022_v8 }
  0xff   :  { %v377_v31 = vsub.f32 %v361_v11, %v376_v53  ;;  %v407_v34 = vsub.f32 %v391_v16, %v406_v54  ;;  %v422_v36 = vmul.f32 %v326_v6, %v1032_v14  ;;  %v440_v38 = vmul.f32 %v326_v6, %v1030_v13 }
 0x100   :  { %v363_v39 = vadd.f32 %v362_v23, %v347_v17  ;;  %v364_v58 = vmul.f32 %v326_v6, %v1028_v12  ;;  %v378_v32 = vmul.f32 %v326_v6, %v1020_v7  ;;  %v339_v41 = vmul.f32 %v1098_v43, %v1018_v4 }
 0x101   :  { %v393_v44 = vadd.f32 %v392_v40, %v377_v31  ;;  %v423_v49 = vsub.f32 %v407_v34, %v422_v36  ;;  %v351_v55 = vadd.f32 %v350_v45, %v338_v5  ;;  %v368_v56 = vmul.f32 %v331_v63, %v1028_v12 }
 0x102   :  { %v365_v57 = vadd.f32 %v364_v58, %v349_v1  ;;  %v379_v53 = vsub.f32 %v363_v39, %v378_v32  ;;  %v353_v54 = vadd.f32 %v352_v46, %v339_v41  ;;  %v382_v59 = vmul.f32 %v331_v63, %v1020_v7 }
 0x103   :  { %v409_v60 = vadd.f32 %v408_v35, %v393_v44  ;;  %v439_v61 = vsub.f32 %v423_v49, %v438_v21  ;;  %v367_v23 = vsub.f32 %v351_v55, %v1062_v27  ;;  %v400_v62 = vmul.f32 %v326_v6, %v1024_v9 }
 0x104   :  { %v381_v0 = vadd.f32 %v1056_v24, %v365_v57  ;;  %v395_v11 = vsub.f32 %v379_v53, %v1042_v18  ;;  %v369_v40 = vsub.f32 %v353_v54, %v368_v56  ;;  %v414_v45 = vmul.f32 %v326_v6, %v1022_v8 }
 0x105   :  { %v425_v5 = vsub.f32 %v409_v60, %v424_v20  ;;  %v383_v16 = vadd.f32 %v382_v59, %v367_v23  ;;  %v430_v46 = vmul.f32 %v1098_v43, %v1032_v14  ;;  %v432_v35 = vmul.f32 %v1108_v48, %v1032_v14 }
 0x106   :  { %v397_v1 = vsub.f32 %v381_v0, %v396_v22  ;;  %v411_v17 = vadd.f32 %v410_v26, %v395_v11  ;;  %v385_v27 = vsub.f32 %v369_v40, %v1066_v28  ;;  %v340_v21 = vmul.f32 %v326_v6, %v1018_v4 }
 0x107   :  { %v441_v24 = vsub.f32 %v425_v5, %v440_v38  ;;  %v399_v18 = vadd.f32 %v1070_v29, %v383_v16  ;;  %v341_v31 = vmul.f32 %v331_v63, %v1018_v4  ;;  %v354_v20 = vmul.f32 %v331_v63, %v1016_v3 }
 0x108   :  { %v413_v34 = vsub.f32 %v397_v1, %v1046_v19  ;;  %v427_v36 = vadd.f32 %v1086_v37, %v411_v17  ;;  %v401_v39 = vadd.f32 %v400_v62, %v385_v27  ;;  %v356_v58 = vmul.f32 %v326_v6, %v1016_v3  ;;  %v470_v62 = vpop.permute.xlu1 %469 }
 0x109   :  { %v780_v22 = vpack.c.bf16 %v441_v24, %v439_v61  ;;  %v415_v26 = vsub.f32 %v399_v18, %v414_v45  ;;  %v355_v32 = vadd.f32 %v354_v20, %v340_v21  ;;  %v372_v28 = vmul.f32 %v1098_v43, %v1028_v12 }
 0x10a   :  { %v429_v38 = vsub.f32 %v413_v34, %v1096_v42  ;;  %v443_v29 = vadd.f32 %v1126_v52, %v427_v36  ;;  %v417_v4 = vadd.f32 %v1076_v33, %v401_v39  ;;  %v357_v63 = vadd.f32 %v356_v58, %v341_v31 }
 0x10b   :  { %781 = vmatprep.subr.bf16.mxu1 %v780_v22  ;;  %v431_v19 = vadd.f32 %v430_v46, %v415_v26  ;;  %v371_v37 = vadd.f32 %v1116_v51, %v355_v32  ;;  %v386_v3 = vmul.f32 %v1072_v30, %v1020_v7  ;;  %v388_v6 = vmul.f32 %v1108_v48, %v1020_v7 }
 0x10c   :  { %783 = vmatpush3.bf16.msra.mxu1 %v780_v22  ;;  %v445_v12 = vsub.f32 %v429_v38, %v1136_v2  ;;  %v433_v41 = vsub.f32 %v417_v4, %v432_v35  ;;  %v373_v42 = vsub.f32 %v357_v63, %v372_v28  ;;  %v402_v52 = vmul.f32 %v1098_v43, %v1024_v9  ;;  %v480_v21 = vpop.permute.xlu1 %479 }
 0x10d   :  { %v447_v33 = vadd.f32 %v1106_v47, %v431_v19  ;;  %v387_v44 = vsub.f32 %v371_v37, %v386_v3  ;;  %v404_v51 = vmul.f32 %v1058_v25, %v1024_v9  ;;  %v418_v49 = vmul.f32 %v1108_v48, %v1022_v8 }
 0x10e   :  { %v784_v55 = vpack.c.bf16 %v445_v12, %v443_v29  ;;  %v449_v7 = vsub.f32 %v433_v41, %v1112_v50  ;;  %v389_v56 = vadd.f32 %v388_v6, %v373_v42  ;;  %v420_v2 = vmul.f32 %v1072_v30, %v1022_v8 }
 0x10f   :  { %v403_v57 = vsub.f32 %v387_v44, %v402_v52  ;;  %v434_v43 = vmul.f32 %v1034_v15, %v1032_v14  ;;  %v436_v47 = vmul.f32 %v1026_v10, %v1032_v14  ;;  %v450_v9 = vmul.f32 %v1026_v10, %v1030_v13  ;;  %v455_v10 = vld [vmem:[%s1228_s3 + $0x8] sm:$0xff]  ;;  %v457_v14 = vld [vmem:[%s1228_s3 + $0x18] sm:$0xff] }
 0x110   :  { %785 = vmatprep.subr.bf16.mxu1 %v784_v55  ;;  %v788_v25 = vpack.c.bf16 %v449_v7, %v447_v33  ;;  %v405_v48 = vadd.f32 %v404_v51, %v389_v56  ;;  %v452_v50 = vmul.f32 %v1034_v15, %v1030_v13  ;;  %v456_v13 = vld [vmem:[%s1228_s3 + $0x10] sm:$0xff]  ;;  %v465_v15 = vpop.permute.xlu0 %464  ;;  %s833_s3 = smov [#allocation2]  }
 0x111   :  { %787 = vmatpush3.bf16.msra.mxu1 %v784_v55  ;;  %v419_v53 = vadd.f32 %v418_v49, %v403_v57  ;;  %s655_s8 = sshll.u32 %s833_s3, 4  ;;  %s656_s8 = int_to_ptr.vmem [resolvable:$true] %s655_s8 }
 0x112   :  { %789 = vmatprep.subr.bf16.mxu1 %v788_v25  ;;  %v421_v8 = vsub.f32 %v405_v48, %v420_v2  ;;  %s808_s9 = scalar_lea.vmem %s656_s8, 512  ;;  %p813_p1 = scmp.lt.s32.totalorder %s656_s8, %s656_s8 }
 0x113   :  { %v435_v30 = vadd.f32 %v434_v43, %v419_v53  ;;  %p809_p0 = scmp.ne.s32.totalorder %s656_s8, %s808_s9  ;;  %p814_p2 = scmp.lt.s32.totalorder %s808_s9, %s808_s9 }
 0x114   :  { %v437_v54 = vadd.f32 %v436_v47, %v421_v8  ;;  %v475_v16 = vpop.permute.xlu0 %474 }
 0x115   :  { %791 = vmatpush3.bf16.msra.mxu1 %v788_v25  ;;  %v451_v59 = vadd.f32 %v450_v9, %v435_v30  ;;  %p815_p3 = por %p814_p2, %p813_p1 }
 0x116   :  { %v453_v60 = vadd.f32 %v452_v50, %v437_v54 }
 0x117   :  { %p816_p4 = pnand %p815_p3, %p809_p0 }
 0x118   :  { %v792_v61 = vpack.c.bf16 %v453_v60, %v451_v59  ;;  %v635_v47 = vpop.permute.xlu0 %634 }
 0x11a   :  { %793 = vmatprep.subr.bf16.mxu1 %v792_v61 }
 0x11b   :  { %795 = vmatpush3.bf16.msra.mxu1 %v792_v61 }
 0x11e   :  { %767 = vmatmul.mubr.msk.f32.vlgmr.msra.gmra.mrb[0].mxu1 %vm482_vm1, %v455_v10 }
 0x11f   :  { %769 = vmatprep.mubr.msk.f32.mxu1 %vm482_vm1, %v456_v13 }
 0x122   :  { %770 = vmatmul.mubr.msk.f32.gmra.mrb[2].mxu1 %vm482_vm1, %v457_v14 }
 0x1f1   :  { %v768_v23 = vpop.f32.mrb[0].mxu1 }
 0x1f2   :  { %v561_v0 = vpop.f32.mrb[1].mxu1  ;;  %v567_v11 = vadd.f32 %v768_v23, %v470_v62 }
 0x1f3   :  { %v562_v40 = vadd.f32 %v561_v0, %v465_v15 }
 0x1f4   :  { %v585_v35 = vmul.f32 %v567_v11, %v567_v11 }
 0x1f5   :  { %v580_v45 = vmul.f32 %v562_v40, %v562_v40  ;;  %v771_v5 = vpop.f32.mrb[2].mxu1 }
 0x1f6   :  { %v571_v46 = vpop.f32.mrb[3].mxu1  ;;  %v588_v24 = vrot.slane %v585_v35, 4  ;;  %v577_v31 = vadd.f32 %v771_v5, %v480_v21 }
 0x1f7   :  { %v582_v1 = vrot.slane %v580_v45, 4  ;;  %v572_v17 = vadd.f32 %v571_v46, %v475_v16 }
 0x1f8   :  { %v597_v36 = vmul.f32 %v577_v31, %v577_v31 }
 0x1f9   :  { %v584_v27 = vadd.f32 %v582_v1, %v580_v45  ;;  %v591_v20 = vmul.f32 %v572_v17, %v572_v17 }
 0x1fa   :  { %v600_v26 = vrot.slane %v597_v36, 4 }
 0x1fb   :  { %v586_v18 = vadd.f32 %v585_v35, %v584_v27  ;;  %v594_v58 = vrot.slane %v591_v20, 4 }
 0x1fd   :  { %v590_v34 = vadd.f32 %v588_v24, %v586_v18 }
 0x1ff   :  { %v592_v39 = vadd.f32 %v591_v20, %v590_v34 }
 0x201   :  { %v596_v22 = vadd.f32 %v594_v58, %v592_v39 }
 0x203   :  { %v598_v32 = vadd.f32 %v597_v36, %v596_v22 }
 0x205   :  { %v602_v28 = vadd.f32 %v600_v26, %v598_v32 }
 0x207   :  { %v603_v38 = vmul.f32 %v602_v28, %v602_v28 }
 0x209   :  { %v604_v29 = vadd.f32 1e-16, %v603_v38 }
 0x20b   :  { %802 = vrsqrt.f32 %v604_v29  ;;  %vm607_vm2 = vcmp.eq.f32.partialorder %v604_v29, inf  ;;  %v610_v19 = vand.u32 2147483648, %v604_v29  ;;  %vm609_vm3 = vcmp.eq.f32.partialorder %v604_v29, 0.0 }
 0x215   :  { %v803_v4 = vpop.eup %802 }
 0x216   :  { %v606_v63 = vmul.f32 %v803_v4, %v604_v29 }
 0x218   :  { %v608_v37 = vsel %vm607_vm2, %v604_v29, %v606_v63 }
 0x219   :  { %v611_v3 = vsel %vm609_vm3, %v610_v19, %v608_v37 }
 0x21a   :  { %804 = vrsqrt.f32 %v611_v3  ;;  %vm614_vm4 = vcmp.eq.f32.partialorder %v611_v3, inf  ;;  %v617_v41 = vand.u32 2147483648, %v611_v3  ;;  %vm616_vm6 = vcmp.eq.f32.partialorder %v611_v3, 0.0 }
 0x224   :  { %v805_v6 = vpop.eup %804 }
 0x225   :  { %v613_v12 = vmul.f32 %v805_v6, %v611_v3 }
 0x227   :  { %v615_v42 = vsel %vm614_vm4, %v611_v3, %v613_v12 }
 0x228   :  { %v618_v52 = vsel %vm616_vm6, %v617_v41, %v615_v42 }
 0x229   :  { %v620_v33 = vsel %vm619_vm5, %v618_v52, 0.0 }
 0x22a   :  { %v621_v44 = vrot.slane %v620_v33, 4 }
 0x22c   :  { %v622_v51 = vadd.f32 %v621_v44, %v620_v33 }
 0x22e   :  { %v623_v49 = vrot.slane %v622_v51, 2 }
 0x230   :  { %v624_v55 = vadd.f32 %v623_v49, %v622_v51 }
 0x232   :  { %v625_v7 = vrot.slane %v624_v55, 1 }
 0x234   :  { %v626_v56 = vadd.f32 %v625_v7, %v624_v55 }
 0x236   :  { %v628_v2 = vmul.f32 0.25, %v626_v56 }
 0x238   :  { %v629_v57 = vadd.f32 1e-06, %v628_v2 }
 0x23a   :  { %806 = vrcp.f32 %v629_v57 }
 0x244   :  { %v807_v43 = vpop.eup %806 }
 0x245   :  { %v637_v9 = vmul.f32 %v807_v43, %v635_v47 }
 0x247   :  { %v639_v25 = vrot.slane %v637_v9, 4 }
 0x249   :  { %v641_v48 = vsel %vm619_vm5, %v637_v9, %v639_v25 }
 0x24a   :  { %v642_v50 = vmul.f32 %v641_v48, %v562_v40  ;;  %v643_v53 = vmul.f32 %v641_v48, %v567_v11  ;;  %v644_v8 = vmul.f32 %v641_v48, %v572_v17  ;;  %v645_v30 = vmul.f32 %v641_v48, %v577_v31 }
 0x24c   :  { %646 = vst [vmem:[#allocation2] sm:$0xff] %v642_v50  ;;  %647 = vst [vmem:[#allocation2 + $0x8] sm:$0xff] %v643_v53 }
 0x24d   :  { %648 = vst [vmem:[#allocation2 + $0x10] sm:$0xff] %v644_v8  ;;  %649 = vst [vmem:[#allocation2 + $0x18] sm:$0xff] %v645_v30 }
 0x24e   :  { %819 = shalt.err (!%p816_p4)
}
 0x24f   :  { %s820_s11 = scalar_lea.hbm %s1231_s6, 512 }
 0x250   :  { %p821_p5 = scmp.ne.s32.totalorder %s1231_s6, %s820_s11  ;;  %p824_p6 = scmp.lt.u32.totalorder %s820_s11, %s1231_s6 }
 0x252   :  { %p826_p7 = pnand %p824_p6, %p821_p5 }
 0x254   :  { %829 = shalt.err (!%p826_p7)
}
 0x255   :  { %s834_s16 = smov 128   ;;  %s835_s17 = smov 8  }
 0x256   :  { %661 = dma.vmem_to_hbm [thread:$0]  %s656_s8, 512, %s1231_s6, [#allocation3], %s834_s16, %s834_s16, %s835_s17  }
 0x257   :  { %830 = dma.done.wait [#allocation3], 512  }
 0x258   :  { %831 = vsyncadd [#allocation3], 4294966784 }
 0x259   :  { %665 = vsyncpa [#allocation3], 1 }

</bundles_post_ra>
